<compile_context>
chip_gen: v7x
topology: tpu7x:2x2x1
jax: 0.10.0
libtpu: 0.0.40
codegen_flags: <defaults>
</compile_context>

<pallas_src>
import functools

import jax
import jax.numpy as jnp
from jax.experimental import pallas as pl
from jax.experimental.pallas import tpu as pltpu


def _round_up(x, m):
    return (x + m - 1) // m * m


def bcnet_kernel(q1_ref, q2_ref, w1_ref, b1_ref, w2_ref, b2_ref,
                 hmat_ref, hbias_ref, out_ref, *, mxu_precision=None):
    BB, T1p, Dq1 = q1_ref.shape
    _, T2f, Dq2 = q2_ref.shape
    H = w1_ref.shape[1]
    h_out = hmat_ref.shape[0]
    T2p = out_ref.shape[2]          # output lane width (>= T2f, ideally %128==0)
    dt = q1_ref.dtype               # MXU operand dtype; accumulation is f32

    # ---- FCNet hot path: one (BB*T, D) x (D, H) MXU matmul per input -------
    # T1p/T2f are multiples of 16, so these reshapes are free views.
    x1 = q1_ref[...].reshape(BB * T1p, Dq1)
    x2 = q2_ref[...].reshape(BB * T2f, Dq2)
    q1n = jnp.maximum(
        jnp.dot(x1, w1_ref[...], preferred_element_type=jnp.float32,
                precision=mxu_precision) + b1_ref[...], 0.0)    # (BB*T1p, H) f32
    q2n = jnp.maximum(
        jnp.dot(x2, w2_ref[...], preferred_element_type=jnp.float32,
                precision=mxu_precision) + b2_ref[...], 0.0)    # (BB*T2f, H) f32

    # ---- glimpse scale on the SMALLER side; scale + cast fused in dt -------
    # s[b, g*T1p + i, h] = h_mat[g, h] * q1n[b, i, h]
    q1nb = q1n.reshape(BB, T1p, H).astype(dt)                   # single cast pass
    s = (hmat_ref[...][None, :, None, :] * q1nb[:, None, :, :]
         ).reshape(BB, h_out * T1p, H)                          # (BB, h_out*T1p, H) dt

    # rhs: cast once, then zero-pad T2f -> T2p lanes AFTER the FCNet so padded
    # rows cost no FCNet FLOPs (padded output columns are sliced in wrapper).
    q2nb = q2n.reshape(BB, T2f, H).astype(dt)
    if T2p > T2f:
        q2nb = jnp.concatenate(
            [q2nb, jnp.zeros((BB, T2p - T2f, H), dt)], axis=1)

    # ---- all glimpses in one batched NT matmul ------------------------------
    # NOTE: rhs contraction sits on the lane axis; if Mosaic emits a per-batch
    # transpose of q2nb it is still dwarfed by the FCNet matmuls (verify with
    # pl.lower_as_mlir if this stage ever shows up on the critical path).
    slab = jnp.einsum('bsh,bjh->bsj', s, q2nb,
                      preferred_element_type=jnp.float32,
                      precision=mxu_precision)                  # (BB, h_out*T1p, T2p)

    # per-glimpse bias column broadcast across lanes + full-width store
    out_ref[...] = (slab + hbias_ref[...][None, :, :]).astype(out_ref.dtype)


def _pick_block_b(B, t_rows, per_batch_bytes, fixed_bytes, vmem_budget):
    """Largest divisor of B giving >= 256 rows on the FCNet MXU matmuls
    (v6e/v7x MXU is 2x256x256; fewer grid steps also amortizes the ~0.35us
    per-step pipeline overhead), shrunk while the VMEM estimate exceeds the
    budget.  NOTE(v7x): pass block_b explicitly if you want an even number of
    grid steps so both TensorCores get equal work (single-TC v5e/v6e prefer
    the largest BB)."""
    divisors = [d for d in range(1, B + 1) if B % d == 0]
    target = min(B, max(1, -(-256 // max(t_rows, 1))))
    bb = max(d for d in divisors if d <= target)
    while bb > 1 and fixed_bytes + bb * per_batch_bytes > vmem_budget:
        bb = max(d for d in divisors if d < bb)
    return bb


def bcnet_forward(q1, q2, w1, b1, w2, b2, h_mat, h_bias, *,
                  block_b=None, dot_dtype=jnp.bfloat16,
                  out_dtype=jnp.float32, out_lane_multiple=128,
                  mxu_precision=None):
    B, T1, Dq1 = q1.shape
    _, T2, Dq2 = q2.shape
    H = w1.shape[1]
    h_out = h_mat.shape[0]

    # Sublane padding (16 covers bf16 packing; 8 suffices for f32) so the
    # in-kernel batch/time reshapes never cross a tile boundary, plus lane
    # padding of the output T2 axis for unmasked stores.
    SUB = 16
    T1p = _round_up(T1, SUB)
    T2f = _round_up(T2, SUB)
    T2p = max(T2f, _round_up(T2, max(1, out_lane_multiple)))

    it_in = jnp.dtype(dot_dtype).itemsize
    it_out = jnp.dtype(out_dtype).itemsize

    # VMEM estimate: weights/biases/h_mat have constant index_maps but are
    # still double-buffered by the default pipeline.  At production D/H mark
    # those specs pipeline_mode=pl.Buffered(1); bf16 operands (the default
    # here) already halve that resident footprint.
    fixed_bytes = 2 * (Dq1 + Dq2 + 2 + h_out) * H * it_in + 2 * h_out * T1p * 4
    per_batch_bytes = (
        2 * (T1p * Dq1 + T2f * Dq2) * it_in        # double-buffered input blocks
        + (T1p + T2f) * H * 4                      # f32 FCNet activations
        + (h_out * T1p + T2p) * H * it_in          # scaled lhs + padded rhs
        + h_out * T1p * T2p * (4 + 2 * it_out))    # f32 slab + dbl-buffered out

    BB = block_b if block_b is not None else _pick_block_b(
        B, min(T1p, T2f), per_batch_bytes, fixed_bytes, 48 * 1024 * 1024)
    assert B % BB == 0, (B, BB)
    nsteps = B // BB
    # Explicit scoped-VMEM limit with headroom, clamped under v7x's 64 MiB.
    vmem_limit = int(min(64 * 1024 * 1024,
                         max(16 * 1024 * 1024,
                             (fixed_bytes + BB * per_batch_bytes) * 3 // 2)))

    # Pad batch/time axes (padded rows/cols are sliced off below) and cast the
    # MXU operands once on the wrapper side.
    q1c = jnp.pad(q1, ((0, 0), (0, T1p - T1), (0, 0))).astype(dot_dtype)
    q2c = jnp.pad(q2, ((0, 0), (0, T2f - T2), (0, 0))).astype(dot_dtype)
    w1c = w1.astype(dot_dtype)
    w2c = w2.astype(dot_dtype)
    b1f = b1.reshape(1, H).astype(jnp.float32)
    b2f = b2.reshape(1, H).astype(jnp.float32)
    hm = h_mat.astype(dot_dtype)
    # per-glimpse bias as a (h_out*T1p, 1) column matching the slab's
    # glimpse-major sublane layout
    hbias_col = jnp.repeat(h_bias.reshape(h_out).astype(jnp.float32),
                           T1p).reshape(h_out * T1p, 1)

    kernel = functools.partial(bcnet_kernel, mxu_precision=mxu_precision)

    slab = pl.pallas_call(
        kernel,
        out_shape=jax.ShapeDtypeStruct((B, h_out * T1p, T2p), out_dtype),
        grid_spec=pltpu.PrefetchScalarGridSpec(
            num_scalar_prefetch=0,
            grid=(nsteps,),
            in_specs=[
                pl.BlockSpec((BB, T1p, Dq1), lambda i: (i, 0, 0)),
                pl.BlockSpec((BB, T2f, Dq2), lambda i: (i, 0, 0)),
                pl.BlockSpec((Dq1, H), lambda i: (0, 0)),
                pl.BlockSpec((1, H), lambda i: (0, 0)),
                pl.BlockSpec((Dq2, H), lambda i: (0, 0)),
                pl.BlockSpec((1, H), lambda i: (0, 0)),
                pl.BlockSpec((h_out, H), lambda i: (0, 0)),
                pl.BlockSpec((h_out * T1p, 1), lambda i: (0, 0)),
            ],
            out_specs=pl.BlockSpec((BB, h_out * T1p, T2p),
                                   lambda i: (i, 0, 0)),
        ),
        compiler_params=pltpu.CompilerParams(
            dimension_semantics=("parallel",),
            vmem_limit_bytes=vmem_limit),
    )(q1c, q2c, w1c, b1f, w2c, b2f, hm, hbias_col)

    # (B, h_out*T1p, T2p) -> (B, h_out, T1, T2): pure view + slice, NO transpose.
    return slab.reshape(B, h_out, T1p, T2p)[:, :, :T1, :T2]


def bcnet_ref(q1, q2, w1, b1, w2, b2, h_mat, h_bias):
    q1n = jax.nn.relu(q1 @ w1 + b1)                             # (B, T1, H)
    q2n = jax.nn.relu(q2 @ w2 + b2)                             # (B, T2, H)
    logits = jnp.einsum('bih,gh,bjh->bgij', q1n, h_mat, q2n)
    return logits + h_bias[None, :, :, None]                    # (B, h_out, T1, T2)


def init_params(key, q1_dim, q2_dim, h_dim, h_out, k=1):
    H = h_dim * k
    k1, k2, k3, k4, k5, k6 = jax.random.split(key, 6)

    def weight_norm_linear(kw, in_dim, out_dim):
        # PyTorch: weight_norm(nn.Linear(in, out), dim=None) -> W = g * V / ||V||_F,
        # with g initialized to ||V||_F, so the folded effective weight is V.
        v = jax.random.normal(kw, (out_dim, in_dim), jnp.float32) * 0.05
        g = jnp.linalg.norm(v)
        w_eff = g * v / jnp.linalg.norm(v)
        return w_eff.T  # (in_dim, out_dim) for x @ W in the kernel

    w1 = weight_norm_linear(k1, q1_dim, H)
    b1 = jax.random.normal(k2, (1, H), jnp.float32) * 0.05
    w2 = weight_norm_linear(k3, q2_dim, H)
    b2 = jax.random.normal(k4, (1, H), jnp.float32) * 0.05
    # nn.Parameter(torch.Tensor(1, h_out, 1, H).normal_()) -> stored as (h_out, H)
    h_mat = jax.random.normal(k5, (h_out, H), jnp.float32)
    # nn.Parameter(torch.Tensor(1, h_out, 1, 1).normal_()) -> stored as (h_out, 1)
    h_bias = jax.random.normal(k6, (h_out, 1), jnp.float32)
    return w1, b1, w2, b2, h_mat, h_bias


if __name__ == "__main__":
    # Small-but-representative shapes: D/H are lane-width multiples (128), while
    # T1/T2 are NOT tile multiples so the sublane/lane padding paths are exercised.
    B, T1, T2 = 2, 8, 12
    q1_dim, q2_dim, h_dim, h_out, k = 128, 128, 128, 4, 1

    key = jax.random.PRNGKey(0)
    kq1, kq2, kp = jax.random.split(key, 3)
    q1 = jax.random.normal(kq1, (B, T1, q1_dim), jnp.float32)
    q2 = jax.random.normal(kq2, (B, T2, q2_dim), jnp.float32)
    params = init_params(kp, q1_dim, q2_dim, h_dim, h_out, k)

    ref = bcnet_ref(q1, q2, *params)

    # Default fast path: bf16 MXU operands, f32 accumulation (all chips).
    out_bf16 = jax.block_until_ready(bcnet_forward(q1, q2, *params))
    assert out_bf16.shape == (B, h_out, T1, T2), out_bf16.shape
    assert jnp.allclose(out_bf16, ref, atol=2e-1, rtol=2e-1), \
        float(jnp.max(jnp.abs(out_bf16 - ref)))

    # f32-operand path (debug / strict accuracy; pass
    # mxu_precision=jax.lax.Precision.HIGHEST for true multi-pass f32 dots).
    out_f32 = jax.block_until_ready(
        bcnet_forward(q1, q2, *params, dot_dtype=jnp.float32))
    assert out_f32.shape == (B, h_out, T1, T2), out_f32.shape
    assert jnp.allclose(out_f32, ref, atol=1e-3, rtol=1e-3), \
        float(jnp.max(jnp.abs(out_f32 - ref)))

    print("KERNEL_OK")
</pallas_src>

<mosaic_0001>
module attributes {stable_mosaic.version = 11 : i64} {
  func.func @bcnet_kernel(%arg0: i32, %arg1: memref<2x16x128xbf16, #tpu.memory_space<vmem>>, %arg2: memref<2x16x128xbf16, #tpu.memory_space<vmem>>, %arg3: memref<128x128xbf16, #tpu.memory_space<vmem>>, %arg4: memref<1x128xf32, #tpu.memory_space<vmem>>, %arg5: memref<128x128xbf16, #tpu.memory_space<vmem>>, %arg6: memref<1x128xf32, #tpu.memory_space<vmem>>, %arg7: memref<4x128xbf16, #tpu.memory_space<vmem>>, %arg8: memref<64x1xf32, #tpu.memory_space<vmem>>, %arg9: memref<2x64x128xf32, #tpu.memory_space<vmem>>) attributes {dimension_semantics = [#tpu.dimension_semantics<parallel>], iteration_bounds = array<i64: 1>, scalar_prefetch = 0 : i64, scratch_operands = 0 : i64, tpu.core_type = #tpu.core_type<tc>, window_params = [{transform_indices = @transform_0, window_bounds = array<i64: 2, 16, 128>}, {transform_indices = @transform_1, window_bounds = array<i64: 2, 16, 128>}, {pipeline_mode = #tpu.pipeline_mode<synchronous>, transform_indices = @transform_2, window_bounds = array<i64: 128, 128>}, {pipeline_mode = #tpu.pipeline_mode<synchronous>, transform_indices = @transform_3, window_bounds = array<i64: 1, 128>}, {pipeline_mode = #tpu.pipeline_mode<synchronous>, transform_indices = @transform_4, window_bounds = array<i64: 128, 128>}, {pipeline_mode = #tpu.pipeline_mode<synchronous>, transform_indices = @transform_5, window_bounds = array<i64: 1, 128>}, {pipeline_mode = #tpu.pipeline_mode<synchronous>, transform_indices = @transform_6, window_bounds = array<i64: 4, 128>}, {pipeline_mode = #tpu.pipeline_mode<synchronous>, transform_indices = @transform_7, window_bounds = array<i64: 64, 1>}, {transform_indices = @transform_8, window_bounds = array<i64: 2, 64, 128>}]} {
    %c0 = arith.constant 0 : index
    %c0_0 = arith.constant 0 : index
    %c0_1 = arith.constant 0 : index
    %0 = vector.load %arg1[%c0, %c0_0, %c0_1] : memref<2x16x128xbf16, #tpu.memory_space<vmem>>, vector<2x16x128xbf16>
    %1 = vector.shape_cast %0 : vector<2x16x128xbf16> to vector<32x128xbf16>
    %c0_2 = arith.constant 0 : index
    %c0_3 = arith.constant 0 : index
    %c0_4 = arith.constant 0 : index
    %2 = vector.load %arg2[%c0_2, %c0_3, %c0_4] : memref<2x16x128xbf16, #tpu.memory_space<vmem>>, vector<2x16x128xbf16>
    %3 = vector.shape_cast %2 : vector<2x16x128xbf16> to vector<32x128xbf16>
    %c0_5 = arith.constant 0 : index
    %c0_6 = arith.constant 0 : index
    %4 = vector.load %arg3[%c0_5, %c0_6] : memref<128x128xbf16, #tpu.memory_space<vmem>>, vector<128x128xbf16>
    %cst = arith.constant dense<0.000000e+00> : vector<32x128xf32>
    %5 = tpu.matmul %1, %4, %cst {dimension_numbers = #tpu.dot_dimension_numbers<[1], [0], [0], [1], [0, 0, 1, 1], [], []>} : vector<32x128xbf16>, vector<128x128xbf16>, vector<32x128xf32> -> vector<32x128xf32>
    %c0_7 = arith.constant 0 : index
    %c0_8 = arith.constant 0 : index
    %6 = vector.load %arg4[%c0_7, %c0_8] : memref<1x128xf32, #tpu.memory_space<vmem>>, vector<1x128xf32>
    %7 = vector.broadcast %6 : vector<1x128xf32> to vector<32x128xf32>
    %8 = arith.addf %5, %7 : vector<32x128xf32>
    %cst_9 = arith.constant 0.000000e+00 : f32
    %9 = vector.broadcast %cst_9 : f32 to vector<32x128xf32>
    %10 = arith.maximumf %8, %9 : vector<32x128xf32>
    %c0_10 = arith.constant 0 : index
    %c0_11 = arith.constant 0 : index
    %11 = vector.load %arg5[%c0_10, %c0_11] : memref<128x128xbf16, #tpu.memory_space<vmem>>, vector<128x128xbf16>
    %cst_12 = arith.constant dense<0.000000e+00> : vector<32x128xf32>
    %12 = tpu.matmul %3, %11, %cst_12 {dimension_numbers = #tpu.dot_dimension_numbers<[1], [0], [0], [1], [0, 0, 1, 1], [], []>} : vector<32x128xbf16>, vector<128x128xbf16>, vector<32x128xf32> -> vector<32x128xf32>
    %c0_13 = arith.constant 0 : index
    %c0_14 = arith.constant 0 : index
    %13 = vector.load %arg6[%c0_13, %c0_14] : memref<1x128xf32, #tpu.memory_space<vmem>>, vector<1x128xf32>
    %14 = vector.broadcast %13 : vector<1x128xf32> to vector<32x128xf32>
    %15 = arith.addf %12, %14 : vector<32x128xf32>
    %cst_15 = arith.constant 0.000000e+00 : f32
    %16 = vector.broadcast %cst_15 : f32 to vector<32x128xf32>
    %17 = arith.maximumf %15, %16 : vector<32x128xf32>
    %18 = vector.shape_cast %10 : vector<32x128xf32> to vector<2x16x128xf32>
    %19 = arith.truncf %18 : vector<2x16x128xf32> to vector<2x16x128xbf16>
    %c0_16 = arith.constant 0 : index
    %c0_17 = arith.constant 0 : index
    %20 = vector.load %arg7[%c0_16, %c0_17] : memref<4x128xbf16, #tpu.memory_space<vmem>>, vector<4x128xbf16>
    %21 = vector.shape_cast %20 : vector<4x128xbf16> to vector<1x4x1x128xbf16>
    %22 = vector.shape_cast %19 : vector<2x16x128xbf16> to vector<2x1x16x128xbf16>
    %23 = vector.broadcast %21 : vector<1x4x1x128xbf16> to vector<2x4x16x128xbf16>
    %24 = vector.broadcast %22 : vector<2x1x16x128xbf16> to vector<2x4x16x128xbf16>
    %25 = arith.mulf %23, %24 : vector<2x4x16x128xbf16>
    %26 = vector.shape_cast %25 : vector<2x4x16x128xbf16> to vector<2x64x128xbf16>
    %27 = vector.shape_cast %17 : vector<32x128xf32> to vector<2x16x128xf32>
    %28 = arith.truncf %27 : vector<2x16x128xf32> to vector<2x16x128xbf16>
    %cst_18 = arith.constant 0.000000e+00 : bf16
    %29 = vector.broadcast %cst_18 : bf16 to vector<2x112x128xbf16>
    %30 = tpu.concatenate %28, %29 in 1 : vector<2x16x128xbf16>, vector<2x112x128xbf16> -> vector<2x128x128xbf16>
    "tpu.trace_start"() <{level = 10 : i32, message = "bsh,bjh->bsj"}> : () -> ()
    %cst_19 = arith.constant dense<0.000000e+00> : vector<2x64x128xf32>
    %31 = tpu.matmul %26, %30, %cst_19 {dimension_numbers = #tpu.dot_dimension_numbers<[2], [2], [1], [1], [0, 0, 0, 1, 1, 1], [0], [0]>} : vector<2x64x128xbf16>, vector<2x128x128xbf16>, vector<2x64x128xf32> -> vector<2x64x128xf32>
    "tpu.trace_stop"() : () -> ()
    %c0_20 = arith.constant 0 : index
    %c0_21 = arith.constant 0 : index
    %32 = vector.load %arg8[%c0_20, %c0_21] : memref<64x1xf32, #tpu.memory_space<vmem>>, vector<64x1xf32>
    %33 = vector.shape_cast %32 : vector<64x1xf32> to vector<1x64x1xf32>
    %34 = vector.broadcast %33 : vector<1x64x1xf32> to vector<2x64x128xf32>
    %35 = arith.addf %31, %34 : vector<2x64x128xf32>
    %c0_22 = arith.constant 0 : index
    %c0_23 = arith.constant 0 : index
    %c0_24 = arith.constant 0 : index
    %36 = vector.load %arg9[%c0_22, %c0_23, %c0_24] : memref<2x64x128xf32, #tpu.memory_space<vmem>>, vector<2x64x128xf32>
    tpu.vector_store %arg9[%c0_22, %c0_23, %c0_24], %35 {strides = array<i32>} : memref<2x64x128xf32, #tpu.memory_space<vmem>>, vector<2x64x128xf32>,
    return
  }
  func.func @transform_0(%arg0: i32) -> (i32, i32, i32) {
    %c0_i32 = arith.constant 0 : i32
    %c0_i32_0 = arith.constant 0 : i32
    %c0_i32_1 = arith.constant 0 : i32
    return %arg0, %c0_i32, %c0_i32_0 : i32, i32, i32
  }
  func.func @transform_1(%arg0: i32) -> (i32, i32, i32) {
    %c0_i32 = arith.constant 0 : i32
    %c0_i32_0 = arith.constant 0 : i32
    %c0_i32_1 = arith.constant 0 : i32
    return %arg0, %c0_i32, %c0_i32_0 : i32, i32, i32
  }
  func.func @transform_2(%arg0: i32) -> (i32, i32) {
    %c0_i32 = arith.constant 0 : i32
    %c0_i32_0 = arith.constant 0 : i32
    %c0_i32_1 = arith.constant 0 : i32
    return %c0_i32, %c0_i32_0 : i32, i32
  }
  func.func @transform_3(%arg0: i32) -> (i32, i32) {
    %c0_i32 = arith.constant 0 : i32
    %c0_i32_0 = arith.constant 0 : i32
    %c0_i32_1 = arith.constant 0 : i32
    return %c0_i32, %c0_i32_0 : i32, i32
  }
  func.func @transform_4(%arg0: i32) -> (i32, i32) {
    %c0_i32 = arith.constant 0 : i32
    %c0_i32_0 = arith.constant 0 : i32
    %c0_i32_1 = arith.constant 0 : i32
    return %c0_i32, %c0_i32_0 : i32, i32
  }
  func.func @transform_5(%arg0: i32) -> (i32, i32) {
    %c0_i32 = arith.constant 0 : i32
    %c0_i32_0 = arith.constant 0 : i32
    %c0_i32_1 = arith.constant 0 : i32
    return %c0_i32, %c0_i32_0 : i32, i32
  }
  func.func @transform_6(%arg0: i32) -> (i32, i32) {
    %c0_i32 = arith.constant 0 : i32
    %c0_i32_0 = arith.constant 0 : i32
    %c0_i32_1 = arith.constant 0 : i32
    return %c0_i32, %c0_i32_0 : i32, i32
  }
  func.func @transform_7(%arg0: i32) -> (i32, i32) {
    %c0_i32 = arith.constant 0 : i32
    %c0_i32_0 = arith.constant 0 : i32
    %c0_i32_1 = arith.constant 0 : i32
    return %c0_i32, %c0_i32_0 : i32, i32
  }
  func.func @transform_8(%arg0: i32) -> (i32, i32, i32) {
    %c0_i32 = arith.constant 0 : i32
    %c0_i32_0 = arith.constant 0 : i32
    %c0_i32_1 = arith.constant 0 : i32
    return %arg0, %c0_i32, %c0_i32_0 : i32, i32, i32
  }
}

</mosaic_0001>

<bundles_post_ra>
// kernel: tpu_custom_call.1
= control target key start
LH: loop header
LB: loop body
LE: loop exit
PB: predicated region body
PF: predicated region fallthrough
CT: control target
= control target key end

     0   :  { %13 = vsyncpa [#allocation3], 0  ;;  %s1063_s0 = inlined_call_operand.hbm [shape: bf16[2,16,128], index: 0, kind: input, shape index: {}]   ;;  %s1064_s1 = inlined_call_operand.hbm [shape: bf16[2,16,128], index: 1, kind: input, shape index: {}]   ;;  %s1065_s2 = inlined_call_operand.vmem [shape: bf16[128,128], index: 2, kind: input, shape index: {}]   ;;  %s1066_s3 = inlined_call_operand.vmem [shape: f32[1,128], index: 3, kind: input, shape index: {}]   ;;  %s1067_s4 = inlined_call_operand.hbm [shape: bf16[128,128], index: 4, kind: input, shape index: {}]   ;;  %s1068_s5 = inlined_call_operand.vmem [shape: f32[1,128], index: 5, kind: input, shape index: {}]   ;;  %s1069_s6 = inlined_call_operand.vmem [shape: bf16[4,128], index: 6, kind: input, shape index: {}]   ;;  %s1070_s7 = inlined_call_operand.vmem [shape: f32[64,1], index: 7, kind: input, shape index: {}]   ;;  %s1071_s8 = inlined_call_operand.hbm [shape: f32[2,64,128], index: 8, kind: output, shape index: {}]  }
   0x1   :  { %14 = vsyncpa [#allocation6], 0 }
   0x2   :  { %15 = vsyncpa [#allocation4], 0  ;;  %s878_s27 = smov [#allocation5]   ;;  %s879_s29 = smov [#allocation2]  }
   0x3   :  { %s33_s28 = sshll.u32 %s878_s27, 4  ;;  %s21_s30 = sshll.u32 %s879_s29, 4  ;;  %s34_s28 = int_to_ptr.vmem [resolvable:$true] %s33_s28  ;;  %s932_s30 = int_to_ptr.vmem [resolvable:$true] %s21_s30 }
   0x4   :  { %s784_s11 = scalar_lea.hbm %s1064_s1, 256 }
   0x5   :  { %p785_p0 = scmp.ne.s32.totalorder %s1064_s1, %s784_s11  ;;  %p788_p1 = scmp.lt.u32.totalorder %s784_s11, %s1064_s1 }
   0x7   :  { %p790_p2 = pnand %p788_p1, %p785_p0 }
   0x9   :  { %793 = shalt.err (!%p790_p2)
}
   0xa   :  { %s794_s16 = scalar_lea.vmem %s34_s28, 256  ;;  %p799_p4 = scmp.lt.s32.totalorder %s34_s28, %s34_s28 }
   0xb   :  { %p795_p3 = scmp.ne.s32.totalorder %s34_s28, %s794_s16  ;;  %p800_p5 = scmp.lt.s32.totalorder %s794_s16, %s794_s16 }
   0xd   :  { %p801_p6 = por %p800_p5, %p799_p4 }
   0xf   :  { %p802_p7 = pnand %p801_p6, %p795_p3 }
  0x11   :  { %805 = shalt.err (!%p802_p7)
}
  0x12   :  { %s880_s17 = smov 64   ;;  %s881_s18 = smov 4  }
  0x13   :  { %39 = dma.hbm_to_vmem [thread:$0]  %s1064_s1, 256, %s34_s28, [#allocation6], %s880_s17, %s880_s17, %s881_s18  }
  0x14   :  { %s806_s23 = scalar_lea.hbm %s1063_s0, 256 }
  0x15   :  { %p807_p8 = scmp.ne.s32.totalorder %s1063_s0, %s806_s23  ;;  %p810_p9 = scmp.lt.u32.totalorder %s806_s23, %s1063_s0 }
  0x17   :  { %p812_p10 = pnand %p810_p9, %p807_p8 }
  0x19   :  { %815 = shalt.err (!%p812_p10)
}
  0x1a   :  { %s816_s29 = scalar_lea.vmem %s932_s30, 256  ;;  %p821_p12 = scmp.lt.s32.totalorder %s932_s30, %s932_s30 }
  0x1b   :  { %p817_p11 = scmp.ne.s32.totalorder %s932_s30, %s816_s29  ;;  %p822_p13 = scmp.lt.s32.totalorder %s816_s29, %s816_s29 }
  0x1d   :  { %p823_p0 = por %p822_p13, %p821_p12 }
  0x1f   :  { %p824_p1 = pnand %p823_p0, %p817_p11 }
  0x21   :  { %827 = shalt.err (!%p824_p1)
}
  0x22   :  { %27 = dma.hbm_to_vmem [thread:$0]  %s1063_s0, 256, %s932_s30, [#allocation3], %s880_s17, %s880_s17, %s881_s18  }
  0x23   :  { %s882_s9 = smov [#allocation7]   ;;  %s828_s13 = scalar_lea.hbm %s1067_s4, 1024 }
  0x24   :  { %s49_s10 = sshll.u32 %s882_s9, 4  ;;  %p829_p2 = scmp.ne.s32.totalorder %s1067_s4, %s828_s13  ;;  %s50_s10 = int_to_ptr.vmem [resolvable:$true] %s49_s10 }
  0x25   :  { %p832_p3 = scmp.lt.u32.totalorder %s828_s13, %s1067_s4 }
  0x27   :  { %p834_p4 = pnand %p832_p3, %p829_p2 }
  0x29   :  { %837 = shalt.err (!%p834_p4)
}
  0x2a   :  { %s838_s20 = scalar_lea.vmem %s50_s10, 1024  ;;  %p843_p6 = scmp.lt.s32.totalorder %s50_s10, %s50_s10 }
  0x2b   :  { %p839_p5 = scmp.ne.s32.totalorder %s50_s10, %s838_s20  ;;  %p844_p7 = scmp.lt.s32.totalorder %s838_s20, %s838_s20 }
  0x2d   :  { %p845_p8 = por %p844_p7, %p843_p6 }
  0x2f   :  { %p846_p9 = pnand %p845_p8, %p839_p5 }
  0x31   :  { %849 = shalt.err (!%p846_p9)
}
  0x32   :  { %55 = dma.hbm_to_vmem [thread:$0]  %s1067_s4, 1024, %s50_s10, [#allocation6], %s880_s17, %s880_s17, %s881_s18  }
  0x33   :  { %872 = dma.done.wait [#allocation3], 256  }
  0x34   :  { %873 = vsyncadd [#allocation3], 4294967040 }
  0x35   :  { %874 = dma.done.wait [#allocation6], 1280  }
  0x36   :  { %875 = vsyncadd [#allocation6], 4294966016  ;;  %v764_v0 = vld [vmem:[#allocation7] sm:$0xff]   ;;  %v766_v2 = vld [vmem:[#allocation7 + $0x8] sm:$0xff]   ;;  %v883_v22 = vmov 0   ;;  %v372_v29 = vlaneseq }
  0x37   :  { %v765_v1 = vld [vmem:[%s1065_s2] sm:$0xff]   ;;  %713 = vmatprep.subr.bf16.mxu1 %v764_v0  ;;  %v767_v3 = vld [vmem:[%s1065_s2 + $0x8] sm:$0xff]   ;;  %v768_v4 = vld [vmem:[#allocation7 + $0x10] sm:$0xff]   ;;  %763 = vset.pattern.permute.xlu1 %v883_v22 }
  0x38   :  { %714 = vmatpush3.bf16.msra.mxu1 %v764_v0  ;;  %693 = vmatprep.subr.bf16.mxu0 %v765_v1  ;;  %v769_v5 = vld [vmem:[%s1065_s2 + $0x10] sm:$0xff]   ;;  %v770_v6 = vld [vmem:[#allocation7 + $0x18] sm:$0xff]   ;;  %v772_v8 = vld [vmem:[#allocation7 + $0x20] sm:$0xff]   ;;  %v373_v30 = vshrl.u32 %v372_v29, 7 }
  0x39   :  { %694 = vmatpush3.bf16.msra.mxu0 %v765_v1  ;;  %715 = vmatprep.subr.bf16.mxu1 %v766_v2  ;;  %v771_v7 = vld [vmem:[%s1065_s2 + $0x18] sm:$0xff]   ;;  %v773_v9 = vld [vmem:[%s1065_s2 + $0x20] sm:$0xff]   ;;  %v774_v10 = vld [vmem:[#allocation7 + $0x28] sm:$0xff]  }
  0x3a   :  { %695 = vmatprep.subr.bf16.mxu0 %v767_v3  ;;  %v780_v11 = vld [vmem:[#allocation5] sm:$0xff]   ;;  %v775_v12 = vld [vmem:[%s1065_s2 + $0x28] sm:$0xff]   ;;  %v782_v13 = vld [vmem:[#allocation2] sm:$0xff]   ;;  %762 = vset.pattern.permute.xlu0 %v883_v22  ;;  %v1035_v33 = vsub.s32 0, %v373_v30 }
  0x3b   :  { %729 = vmatprep.mubr.bf16.mxu1 %v780_v11  ;;  %v776_v14 = vld [vmem:[#allocation7 + $0x30] sm:$0xff]   ;;  %709 = vmatprep.mubr.bf16.mxu0 %v782_v13  ;;  %v778_v16 = vld [vmem:[#allocation7 + $0x38] sm:$0xff]   ;;  %v783_v19 = vld [vmem:[#allocation2 + $0x8] sm:$0xff]  }
  0x3c   :  { %716 = vmatpush3.bf16.msra.mxu1 %v766_v2  ;;  %v777_v15 = vld [vmem:[%s1065_s2 + $0x30] sm:$0xff]   ;;  %v779_v17 = vld [vmem:[%s1065_s2 + $0x38] sm:$0xff]   ;;  %v426_v21 = vld [vmem:[%s1070_s7] sm:$0xff] }
  0x3d   :  { %696 = vmatpush3.bf16.msra.mxu0 %v767_v3  ;;  %717 = vmatprep.subr.bf16.mxu1 %v768_v4  ;;  %v781_v18 = vld [vmem:[#allocation5 + $0x8] sm:$0xff]   ;;  %v428_v20 = vld [vmem:[%s1070_s7 + $0x10] sm:$0xff]  ;;  %v427_v24 = vld [vmem:[%s1070_s7 + $0x8] sm:$0xff] }
  0x3e   :  { %697 = vmatprep.subr.bf16.mxu0 %v769_v5  ;;  %446 = vperm.xlu1 %763, %v428_v20   ;;  %v429_v23 = vld [vmem:[%s1070_s7 + $0x18] sm:$0xff]  ;;  %v431_v25 = vld [vmem:[%s1070_s7 + $0x28] sm:$0xff]  ;;  %v430_v26 = vld [vmem:[%s1070_s7 + $0x20] sm:$0xff] }
  0x3f   :  { %436 = vperm.xlu0 %762, %v426_v21   ;;  %v433_v27 = vld [vmem:[%s1070_s7 + $0x38] sm:$0xff]  ;;  %v432_v28 = vld [vmem:[%s1070_s7 + $0x30] sm:$0xff]  ;;  %v660_v31 = vld.sshfl [vmem:[%s1069_s6] sm:$0x11 pattern:$0x75316420] }
  0x40   :  { %718 = vmatpush3.bf16.msra.mxu1 %v768_v4  ;;  %v661_v32 = vpack.i.b16 %v660_v31, %v660_v31  ;;  %v365_v34 = vunpack.i.h.s16 %v660_v31  ;;  %v649_v35 = vld [vmem:[%s1068_s5] ss:$0 sm:$0xff]  ;;  %v363_v37 = vcombine.high %v660_v31, %v660_v31 }
  0x41   :  { %698 = vmatpush3.bf16.msra.mxu0 %v769_v5  ;;  %719 = vmatprep.subr.bf16.mxu1 %v770_v6  ;;  %v638_v38 = vld [vmem:[%s1066_s3] ss:$0 sm:$0xff]  ;;  %s884_s3 = smov [#allocation8]  }
  0x42   :  { %699 = vmatprep.subr.bf16.mxu0 %v771_v7  ;;  %451 = vperm.xlu1 %763, %v429_v23   ;;  %v375_v36 = vrot.slane %v661_v32, %v1035_v33  ;;  %v369_v39 = vpack.i.b16 %v365_v34, %v365_v34  ;;  %v662_v41 = vpack.i.b16 %v363_v37, %v363_v37  ;;  %v367_v55 = vunpack.i.h.s16 %v363_v37  ;;  %s625_s5 = sshll.u32 %s884_s3, 4  ;;  %s626_s5 = int_to_ptr.vmem [resolvable:$true] %s625_s5 }
  0x43   :  { %441 = vperm.xlu0 %762, %v427_v24   ;;  %s850_s6 = scalar_lea.vmem %s626_s5, 2048  ;;  %p855_p11 = scmp.lt.s32.totalorder %s626_s5, %s626_s5 }
  0x44   :  { %720 = vmatpush3.bf16.msra.mxu1 %v770_v6  ;;  %v389_v49 = vpack.i.b16 %v375_v36, %v375_v36  ;;  %v379_v54 = vrot.slane %v369_v39, %v1035_v33  ;;  %v383_v60 = vrot.slane %v662_v41, %v1035_v33  ;;  %p851_p10 = scmp.ne.s32.totalorder %s626_s5, %s850_s6  ;;  %p856_p12 = scmp.lt.s32.totalorder %s850_s6, %s850_s6 }
  0x45   :  { %700 = vmatpush3.bf16.msra.mxu0 %v771_v7  ;;  %721 = vmatprep.subr.bf16.mxu1 %v772_v8 }
  0x46   :  { %701 = vmatprep.subr.bf16.mxu0 %v773_v9  ;;  %461 = vperm.xlu1 %763, %v431_v25   ;;  %v394_v4 = vrot.slane %v389_v49, %v1035_v33  ;;  %v396_v7 = vpack.i.b16 %v379_v54, %v379_v54  ;;  %v403_v11 = vpack.i.b16 %v383_v60, %v383_v60  ;;  %p857_p13 = por %p856_p12, %p855_p11 }
  0x47   :  { %456 = vperm.xlu0 %762, %v430_v26  }
  0x48   :  { %722 = vmatpush3.bf16.msra.mxu1 %v772_v8  ;;  %v371_v8 = vpack.i.b16 %v367_v55, %v367_v55  ;;  %p858_p0 = pnand %p857_p13, %p851_p10 }
  0x49   :  { %702 = vmatpush3.bf16.msra.mxu0 %v773_v9  ;;  %723 = vmatprep.subr.bf16.mxu1 %v774_v10 }
  0x4a   :  { %703 = vmatprep.subr.bf16.mxu0 %v775_v12  ;;  %471 = vperm.xlu1 %763, %v433_v27  }
  0x4b   :  { %466 = vperm.xlu0 %762, %v432_v28  }
  0x4c   :  { %724 = vmatpush3.bf16.msra.mxu1 %v774_v10 }
  0x4d   :  { %704 = vmatpush3.bf16.msra.mxu0 %v775_v12  ;;  %725 = vmatprep.subr.bf16.mxu1 %v776_v14 }
  0x4e   :  { %705 = vmatprep.subr.bf16.mxu0 %v777_v15 }
  0x50   :  { %726 = vmatpush3.bf16.msra.mxu1 %v776_v14 }
  0x51   :  { %706 = vmatpush3.bf16.msra.mxu0 %v777_v15  ;;  %727 = vmatprep.subr.bf16.mxu1 %v778_v16  ;;  %v401_v15 = vrot.slane %v396_v7, %v1035_v33 }
  0x52   :  { %707 = vmatprep.subr.bf16.mxu0 %v779_v17 }
  0x54   :  { %728 = vmatpush3.bf16.msra.mxu1 %v778_v16  ;;  %v387_v16 = vrot.slane %v371_v8, %v1035_v33 }
  0x55   :  { %708 = vmatpush3.bf16.msra.mxu0 %v779_v17  ;;  %v408_v17 = vrot.slane %v403_v11, %v1035_v33 }
  0x57   :  { %730 = vmatmul.mubr.bf16.vlgmr.msra.gmra.mrb[0].mxu1 %v781_v18 }
  0x58   :  { %710 = vmatmul.mubr.bf16.vlgmr.msra.gmra.mrb[0].mxu0 %v783_v19  ;;  %v410_v19 = vpack.i.b16 %v387_v16, %v387_v16 }
  0x5a   :  { %v415_v23 = vrot.slane %v410_v19, %v1035_v33 }
  0xbd   :  { %v447_v26 = vpop.permute.xlu1 %446 }
  0xbe   :  { %v437_v27 = vpop.permute.xlu0 %436 }
  0xc1   :  { %v452_v28 = vpop.permute.xlu1 %451 }
  0xc2   :  { %v442_v29 = vpop.permute.xlu0 %441 }
  0xc5   :  { %v462_v30 = vpop.permute.xlu1 %461 }
  0xc6   :  { %v457_v31 = vpop.permute.xlu0 %456 }
  0xca   :  { %v467_v49 = vpop.permute.xlu0 %466 }
 0x12a   :  { %v731_v40 = vpop.f32.mrb[0].mxu1 }
 0x12b   :  { %v342_v42 = vadd.f32 %v731_v40, %v649_v35  ;;  %v333_v43 = vpop.f32.mrb[1].mxu1  ;;  %v711_v44 = vpop.f32.mrb[0].mxu0 }
 0x12c   :  { %v334_v45 = vadd.f32 %v649_v35, %v333_v43  ;;  %v732_v46 = vpop.f32.mrb[2].mxu1  ;;  %v206_v47 = vadd.f32 %v711_v44, %v638_v38  ;;  %v197_v48 = vpop.f32.mrb[1].mxu0 }
 0x12d   :  { %v345_v50 = vadd.f32 %v732_v46, %v649_v35  ;;  %v336_v51 = vpop.f32.mrb[3].mxu1  ;;  %v198_v52 = vadd.f32 %v638_v38, %v197_v48  ;;  %v712_v53 = vpop.f32.mrb[2].mxu0  ;;  %v350_v61 = vmax.f32 %v342_v42, 0.0 }
 0x12e   :  { %v214_v56 = vmax.f32 %v206_v47, 0.0  ;;  %v337_v57 = vadd.f32 %v649_v35, %v336_v51  ;;  %v209_v58 = vadd.f32 %v712_v53, %v638_v38  ;;  %v200_v59 = vpop.f32.mrb[3].mxu0  ;;  %v348_v1 = vmax.f32 %v334_v45, 0.0  ;;  %v472_v48 = vpop.permute.xlu1 %471 }
 0x12f   :  { %v351_v62 = vmax.f32 %v345_v50, 0.0  ;;  %v212_v63 = vmax.f32 %v198_v52, 0.0  ;;  %v201_v0 = vadd.f32 %v638_v38, %v200_v59 }
 0x130   :  { %v349_v2 = vmax.f32 %v337_v57, 0.0  ;;  %v215_v3 = vmax.f32 %v209_v58, 0.0 }
 0x131   :  { %v425_v5 = vpack.c.bf16 %v351_v62, %v350_v61  ;;  %v213_v6 = vmax.f32 %v201_v0, 0.0 }
 0x132   :  { %v424_v9 = vpack.c.bf16 %v349_v2, %v348_v1  ;;  %v353_v10 = vpack.c.bf16 %v215_v3, %v214_v56 }
 0x133   :  { %v352_v12 = vpack.c.bf16 %v213_v6, %v212_v63  ;;  %743 = vmatprep.subr.bf16.mxu1 %v425_v5 }
 0x134   :  { %733 = vmatprep.subr.bf16.mxu0 %v424_v9  ;;  %744 = vmatpush3.bf16.xpose.msra.mxu1 %v425_v5  ;;  %v420_v13 = vmul.bf16 %v394_v4, %v353_v10  ;;  %v421_v18 = vmul.bf16 %v401_v15, %v353_v10  ;;  %v422_v21 = vmul.bf16 %v408_v17, %v353_v10 }
 0x135   :  { %734 = vmatpush3.bf16.xpose.msra.mxu0 %v424_v9  ;;  %v416_v14 = vmul.bf16 %v394_v4, %v352_v12  ;;  %v417_v20 = vmul.bf16 %v401_v15, %v352_v12  ;;  %v418_v22 = vmul.bf16 %v408_v17, %v352_v12  ;;  %v423_v24 = vmul.bf16 %v415_v23, %v353_v10 }
 0x136   :  { %745 = vmatprep.mubr.bf16.mxu1 %v420_v13  ;;  %v419_v25 = vmul.bf16 %v415_v23, %v352_v12 }
 0x137   :  { %735 = vmatprep.mubr.bf16.mxu0 %v416_v14 }
 0x13b   :  { %746 = vmatmul.mubr.bf16.vlgmr.msra.gmra.mrb[4].mxu1 %v421_v18 }
 0x13c   :  { %736 = vmatmul.mubr.bf16.vlgmr.msra.gmra.mrb[4].mxu0 %v417_v20  ;;  %749 = vmatprep.mubr.bf16.mxu1 %v422_v21 }
 0x13d   :  { %739 = vmatprep.mubr.bf16.mxu0 %v418_v22 }
 0x143   :  { %750 = vmatmul.mubr.bf16.gmra.mrb[8].mxu1 %v423_v24 }
 0x144   :  { %740 = vmatmul.mubr.bf16.gmra.mrb[8].mxu0 %v419_v25 }
 0x20e   :  { %v747_v32 = vpop.f32.mrb[4].mxu1 }
 0x20f   :  { %v582_v34 = vadd.f32 %v747_v32, %v447_v26  ;;  %v737_v35 = vpop.f32.mrb[4].mxu0  ;;  %v573_v36 = vpop.f32.mrb[5].mxu1 }
 0x210   :  { %v517_v37 = vadd.f32 %v737_v35, %v447_v26  ;;  %v574_v38 = vadd.f32 %v573_v36, %v437_v27  ;;  %v508_v39 = vpop.f32.mrb[5].mxu0  ;;  %v748_v40 = vpop.f32.mrb[6].mxu1 }
 0x211   :  { %614 = vst [vmem:[#allocation8 + $0x50] sm:$0xff] %v582_v34  ;;  %v509_v33 = vadd.f32 %v508_v39, %v437_v27  ;;  %v585_v41 = vadd.f32 %v748_v40, %v452_v28  ;;  %v738_v42 = vpop.f32.mrb[6].mxu0  ;;  %v576_v43 = vpop.f32.mrb[7].mxu1 }
 0x212   :  { %606 = vst [vmem:[#allocation8 + $0x10] sm:$0xff] %v517_v37  ;;  %612 = vst [vmem:[#allocation8 + $0x40] sm:$0xff] %v574_v38  ;;  %v520_v44 = vadd.f32 %v738_v42, %v452_v28  ;;  %v577_v45 = vadd.f32 %v576_v43, %v442_v29  ;;  %v511_v46 = vpop.f32.mrb[7].mxu0 }
 0x213   :  { %604 = vst [vmem:[#allocation8] sm:$0xff] %v509_v33  ;;  %615 = vst [vmem:[#allocation8 + $0x58] sm:$0xff] %v585_v41  ;;  %v512_v47 = vadd.f32 %v511_v46, %v442_v29 }
 0x214   :  { %607 = vst [vmem:[#allocation8 + $0x18] sm:$0xff] %v520_v44  ;;  %613 = vst [vmem:[#allocation8 + $0x48] sm:$0xff] %v577_v45 }
 0x215   :  { %605 = vst [vmem:[#allocation8 + $0x8] sm:$0xff] %v512_v47 }
 0x216   :  { %v751_v50 = vpop.f32.mrb[8].mxu1 }
 0x217   :  { %v598_v51 = vadd.f32 %v751_v50, %v467_v49  ;;  %v741_v52 = vpop.f32.mrb[8].mxu0  ;;  %v589_v53 = vpop.f32.mrb[9].mxu1 }
 0x218   :  { %v533_v54 = vadd.f32 %v741_v52, %v467_v49  ;;  %v590_v55 = vadd.f32 %v589_v53, %v457_v31  ;;  %v524_v56 = vpop.f32.mrb[9].mxu0  ;;  %v752_v57 = vpop.f32.mrb[10].mxu1 }
 0x219   :  { %618 = vst [vmem:[#allocation8 + $0x70] sm:$0xff] %v598_v51  ;;  %v525_v58 = vadd.f32 %v524_v56, %v457_v31  ;;  %v601_v59 = vadd.f32 %v752_v57, %v472_v48  ;;  %v742_v60 = vpop.f32.mrb[10].mxu0  ;;  %v592_v61 = vpop.f32.mrb[11].mxu1 }
 0x21a   :  { %610 = vst [vmem:[#allocation8 + $0x30] sm:$0xff] %v533_v54  ;;  %616 = vst [vmem:[#allocation8 + $0x60] sm:$0xff] %v590_v55  ;;  %v536_v62 = vadd.f32 %v742_v60, %v472_v48  ;;  %v593_v63 = vadd.f32 %v592_v61, %v462_v30  ;;  %v527_v0 = vpop.f32.mrb[11].mxu0 }
 0x21b   :  { %608 = vst [vmem:[#allocation8 + $0x20] sm:$0xff] %v525_v58  ;;  %619 = vst [vmem:[#allocation8 + $0x78] sm:$0xff] %v601_v59  ;;  %v528_v1 = vadd.f32 %v527_v0, %v462_v30 }
 0x21c   :  { %611 = vst [vmem:[#allocation8 + $0x38] sm:$0xff] %v536_v62  ;;  %617 = vst [vmem:[#allocation8 + $0x68] sm:$0xff] %v593_v63 }
 0x21d   :  { %609 = vst [vmem:[#allocation8 + $0x28] sm:$0xff] %v528_v1 }
 0x21e   :  { %861 = shalt.err (!%p858_p0)
}
 0x21f   :  { %s862_s9 = scalar_lea.hbm %s1071_s8, 2048 }
 0x220   :  { %p863_p1 = scmp.ne.s32.totalorder %s1071_s8, %s862_s9  ;;  %p866_p2 = scmp.lt.u32.totalorder %s862_s9, %s1071_s8 }
 0x222   :  { %p868_p3 = pnand %p866_p2, %p863_p1 }
 0x224   :  { %871 = shalt.err (!%p868_p3)
}
 0x225   :  { %s885_s14 = smov 128   ;;  %s886_s15 = smov 8  }
 0x226   :  { %631 = dma.vmem_to_hbm [thread:$0]  %s626_s5, 2048, %s1071_s8, [#allocation4], %s885_s14, %s885_s14, %s886_s15  }
 0x227   :  { %876 = dma.done.wait [#allocation4], 2048  }
 0x228   :  { %877 = vsyncadd [#allocation4], 4294965248 }
 0x229   :  { %635 = vsyncpa [#allocation3], 1 }
 0x22a   :  { %636 = vsyncpa [#allocation6], 1 }
 0x22b   :  { %637 = vsyncpa [#allocation4], 1 }

</bundles_post_ra>
